<compile_context>
chip_gen: v5e
topology: v5e:2x2
jax: 0.10.0
libtpu: 0.0.40
codegen_flags: <defaults>
</compile_context>

<pallas_src>
import jax
import jax.numpy as jnp
from jax.experimental import pallas as pl
from jax.experimental.pallas import tpu as pltpu


def _cdiv(a: int, b: int) -> int:
    return (a + b - 1) // b


# ------------------------------ Pallas kernel ------------------------------ #
def _dot_kernel(z_ref, w_ref, o_ref):
    # One MXU matmul per tile; f32 accumulation, no explicit input casts.
    o_ref[...] = jnp.dot(
        z_ref[...], w_ref[...], preferred_element_type=jnp.float32
    ).astype(o_ref.dtype)


# Target per-step DMA size for the streamed Z operand.  4 MiB double-buffered
# plus the resident selector stays well under the 32 MiB scoped-VMEM default
# (the binding budget on v7x), while being large enough to amortize the
# ~0.35 us/step grid overhead against HBM transfer time on all generations.
_TARGET_TILE_BYTES = 4 * 1024 * 1024
# Packing granularity: Z rows folded into one lane-dense, 128-wide output row.
_G = 128
# Use the packed path only while the baked selector matrix stays small.
_MAX_W_BYTES = 8 * 1024 * 1024


def _forward_packed(Z, b, N, D, out_dtype, itemsize):
    """Lane-dense packed path: out = (Z reshaped to (N/G, G*D)) @ W."""
    G = _G
    # Pad N up to a multiple of G so the (N, D) -> (N/G, G*D) reshape is exact.
    # Free when N % G == 0; otherwise costs one bounded pad/copy in the wrapper.
    n_pad = _cdiv(N, G) * G
    if n_pad != N:
        Z = jnp.pad(Z, ((0, n_pad - N), (0, 0)))
    Np = n_pad // G
    Zp = Z.reshape(Np, G * D)  # row-major contiguous: free reshape

    # Block-diagonal selector with b baked in:  W[g*D + d, g] = b[d].
    # out_packed[i, g] = sum_d Zp[i, g*D + d] * b[d] = (Z @ b)[i*G + g].
    eye = jnp.eye(G, dtype=out_dtype)
    W = (eye[:, None, :] * b.astype(out_dtype)[None, :, None]).reshape(G * D, G)

    # Packed-row tile size: ~_TARGET_TILE_BYTES of Z per grid step, a multiple
    # of 8 sublanes (or the full array when it is small).
    bytes_per_packed_row = G * D * itemsize
    tnp = max(8, (_TARGET_TILE_BYTES // bytes_per_packed_row) // 8 * 8)
    tnp = min(tnp, Np)
    grid = (_cdiv(Np, tnp),)

    out_packed = pl.pallas_call(
        _dot_kernel,
        out_shape=jax.ShapeDtypeStruct((Np, G), out_dtype),
        grid_spec=pl.GridSpec(
            grid=grid,
            in_specs=[
                # Streamed, pipelined Z tiles.
                pl.BlockSpec((tnp, G * D), lambda i: (i, 0)),
                # Selector stays resident across all grid steps.
                pl.BlockSpec((G * D, G), lambda i: (0, 0)),
            ],
            # Lane-dense (tnp, 128) output -> unmasked vector stores.
            out_specs=pl.BlockSpec((tnp, G), lambda i: (i, 0)),
        ),
        compiler_params=pltpu.CompilerParams(
            # Independent tiles: shard across both TensorCores on v7x.
            dimension_semantics=("parallel",),
        ),
    )(Zp, W)

    # (Np, G) -> (Np*G, 1), drop padding rows.  Reshape is free; slice is tiny.
    return out_packed.reshape(n_pad, 1)[:N]


def _forward_plain(Z, b, N, D, out_dtype, itemsize):
    """Fallback for very large D: tiled (TN, D) @ (D, 1) mat-vec on the MXU."""
    # TODO(synk): for huge D a two-level (row x feature) tiling with a
    # lane-dense output slab would be better than the (TN, 1) output here.
    b_col = b.astype(out_dtype).reshape(D, 1)
    tn = max(8, (_TARGET_TILE_BYTES // (D * itemsize)) // 8 * 8)
    tn = min(tn, N)
    grid = (_cdiv(N, tn),)
    return pl.pallas_call(
        _dot_kernel,
        out_shape=jax.ShapeDtypeStruct((N, 1), out_dtype),
        grid_spec=pl.GridSpec(
            grid=grid,
            in_specs=[
                pl.BlockSpec((tn, D), lambda i: (i, 0)),
                pl.BlockSpec((D, 1), lambda i: (0, 0)),
            ],
            out_specs=pl.BlockSpec((tn, 1), lambda i: (i, 0)),
        ),
        compiler_params=pltpu.CompilerParams(
            dimension_semantics=("parallel",),
        ),
    )(Z, b_col)


def random_effect_forward(Z: jax.Array, b: jax.Array) -> jax.Array:
    """Pallas implementation of RandomEffectLayer.forward.

    Z: (N, D) with D == nr_groups * nr_random_effects
    b: (D,)
    returns: (N, 1)
    """
    N, D = Z.shape
    assert b.shape == (D,)
    out_dtype = Z.dtype
    itemsize = jnp.dtype(out_dtype).itemsize

    w_bytes = _G * D * _G * itemsize
    if w_bytes <= _MAX_W_BYTES:
        return _forward_packed(Z, b, N, D, out_dtype, itemsize)
    return _forward_plain(Z, b, N, D, out_dtype, itemsize)


# ----------------------- deterministic parameter init ---------------------- #
def init_random_effect_params(key, nr_groups: int, random_effect: str):
    """Mirrors RandomEffectLayer.__init__ (synthetic, deterministic init)."""
    if nr_groups < 1:
        raise ValueError("Number of groups is not positive!")
    if random_effect not in ("slopes", "intercepts"):
        raise ValueError(f"Random effect type {random_effect} not found!")

    k_vi, k_vs, k_cov, k_b = jax.random.split(key, 4)

    params = {}
    params["variances_intercept"] = jax.nn.softplus(
        jax.random.normal(k_vi, (nr_groups,)) * 0.5
    )
    if random_effect == "slopes":
        K = 2
        params["variances_slopes"] = jax.nn.softplus(
            jax.random.normal(k_vs, (nr_groups,)) * 0.5
        )
        params["covariances"] = jnp.abs(
            jax.random.normal(k_cov, (nr_groups,)) * 0.1 + 1e-5
        )
    else:
        K = 1

    params["b"] = jax.random.normal(k_b, (K * nr_groups,))
    return params, K


def get_covariance_matrix(params, random_effect: str):
    """Plain-JAX glue equivalent of RandomEffectLayer.get_covariance_matrix."""
    if random_effect == "intercepts":
        return jnp.diag(params["variances_intercept"])
    block_a = jnp.diag(params["variances_intercept"])
    block_b = jnp.diag(
        params["covariances"]
        * params["variances_intercept"]
        * params["variances_slopes"]
    )
    block_c = jnp.diag(params["variances_slopes"])
    upper = jnp.concatenate([block_a, block_b], axis=1)
    lower = jnp.concatenate([block_b.T, block_c], axis=1)
    return jnp.concatenate([upper, lower], axis=0)


# --------------------------------- main ------------------------------------ #
def _rel_l2(a, b):
    return float(jnp.linalg.norm(a - b) / (jnp.linalg.norm(b) + 1e-12))


if __name__ == "__main__":
    key = jax.random.PRNGKey(0)
    k_params, k_z1, k_z2 = jax.random.split(key, 3)

    nr_groups = 8
    random_effect = "slopes"           # K = 2  ->  D = 16
    params, K = init_random_effect_params(k_params, nr_groups, random_effect)
    D = nr_groups * K
    b = params["b"].astype(jnp.float32)

    # Aligned batch (multiple of the 128-row packing factor -> zero-cost pack).
    N = 256
    Z = jax.random.normal(k_z1, (N, D), dtype=jnp.float32)
    out = jax.block_until_ready(random_effect_forward(Z, b))
    ref = (Z @ b)[:, None]
    assert out.shape == (N, 1), out.shape
    # Relative-L2 check: tolerant of MXU default-precision (bf16-input) passes,
    # still far below any structural-bug error (which would be O(1)).
    err = _rel_l2(out, ref)
    assert err < 1e-2, err

    # Unaligned batch (exercises the wrapper padding / ragged path).
    N2 = 100
    Z2 = jax.random.normal(k_z2, (N2, D), dtype=jnp.float32)
    out2 = jax.block_until_ready(random_effect_forward(Z2, b))
    ref2 = (Z2 @ b)[:, None]
    assert out2.shape == (N2, 1), out2.shape
    err2 = _rel_l2(out2, ref2)
    assert err2 < 1e-2, err2

    # Covariance-matrix assembly (plain-JAX glue, not a hot path).
    cov = get_covariance_matrix(params, random_effect)
    assert cov.shape == (2 * nr_groups, 2 * nr_groups)

    print("KERNEL_OK")
</pallas_src>

<mosaic_0001>
module attributes {stable_mosaic.version = 11 : i64} {
  func.func @_dot_kernel(%arg0: i32, %arg1: memref<2x2048xf32, #tpu.memory_space<vmem>>, %arg2: memref<2048x128xf32, #tpu.memory_space<vmem>>, %arg3: memref<2x128xf32, #tpu.memory_space<vmem>>) attributes {dimension_semantics = [#tpu.dimension_semantics<parallel>], iteration_bounds = array<i64: 1>, scalar_prefetch = 0 : i64, scratch_operands = 0 : i64, tpu.core_type = #tpu.core_type<tc>, window_params = [{transform_indices = @transform_0, window_bounds = array<i64: 2, 2048>}, {pipeline_mode = #tpu.pipeline_mode<synchronous>, transform_indices = @transform_1, window_bounds = array<i64: 2048, 128>}, {transform_indices = @transform_2, window_bounds = array<i64: 2, 128>}]} {
    %c0 = arith.constant 0 : index
    %c0_0 = arith.constant 0 : index
    %0 = vector.load %arg1[%c0, %c0_0] : memref<2x2048xf32, #tpu.memory_space<vmem>>, vector<2x2048xf32>
    %c0_1 = arith.constant 0 : index
    %c0_2 = arith.constant 0 : index
    %1 = vector.load %arg2[%c0_1, %c0_2] : memref<2048x128xf32, #tpu.memory_space<vmem>>, vector<2048x128xf32>
    %cst = arith.constant dense<0.000000e+00> : vector<2x128xf32>
    %2 = tpu.matmul %0, %1, %cst {dimension_numbers = #tpu.dot_dimension_numbers<[1], [0], [0], [1], [0, 0, 1, 1], [], []>} : vector<2x2048xf32>, vector<2048x128xf32>, vector<2x128xf32> -> vector<2x128xf32>
    %c0_3 = arith.constant 0 : index
    %c0_4 = arith.constant 0 : index
    %3 = vector.load %arg3[%c0_3, %c0_4] : memref<2x128xf32, #tpu.memory_space<vmem>>, vector<2x128xf32>
    tpu.vector_store %arg3[%c0_3, %c0_4], %2 {strides = array<i32>} : memref<2x128xf32, #tpu.memory_space<vmem>>, vector<2x128xf32>,
    return
  }
  func.func @transform_0(%arg0: i32) -> (i32, i32) {
    %c0_i32 = arith.constant 0 : i32
    %c0_i32_0 = arith.constant 0 : i32
    return %arg0, %c0_i32 : i32, i32
  }
  func.func @transform_1(%arg0: i32) -> (i32, i32) {
    %c0_i32 = arith.constant 0 : i32
    %c0_i32_0 = arith.constant 0 : i32
    %c0_i32_1 = arith.constant 0 : i32
    return %c0_i32, %c0_i32_0 : i32, i32
  }
  func.func @transform_2(%arg0: i32) -> (i32, i32) {
    %c0_i32 = arith.constant 0 : i32
    %c0_i32_0 = arith.constant 0 : i32
    return %arg0, %c0_i32 : i32, i32
  }
}

</mosaic_0001>

<bundles_post_ra>
// kernel: tpu_custom_call.1
= control target key start
LH: loop header
LB: loop body
LE: loop exit
PB: predicated region body
PF: predicated region fallthrough
CT: control target
= control target key end

     0   :  { %7 = vsyncpa [#allocation3], 0  ;;  %s815_s0 = inlined_call_operand.hbm [shape: f32[2,2048], index: 0, kind: input, shape index: {}]   ;;  %s816_s1 = inlined_call_operand.hbm [shape: f32[2048,128], index: 1, kind: input, shape index: {}]   ;;  %s817_s2 = inlined_call_operand.hbm [shape: f32[2,128], index: 2, kind: output, shape index: {}]  }
   0x1   :  { %8 = vsyncpa [#allocation6], 0 }
   0x2   :  { %9 = vsyncpa [#allocation4], 0  ;;  %s15_s11 = sshll.u32 %s815_s0, 4  ;;  %s765_s12 = smov [#allocation2]   ;;  %s16_s11 = int_to_ptr.hbm [resolvable:$true] %s15_s11 }
   0x3   :  { %s17_s13 = sshll.u32 %s765_s12, 4  ;;  %s25_s16 = sshll.u32 %s816_s1, 4  ;;  %s18_s13 = int_to_ptr.vmem [resolvable:$true] %s17_s13  ;;  %s26_s16 = int_to_ptr.hbm [resolvable:$true] %s25_s16 }
   0x4   :  { %20 = dma.hbm_to_vmem [thread:$0]  %s16_s11, 512, %s18_s13, [#allocation3]  }
   0x5   :  { %s766_s17 = smov [#allocation5]   ;;  %s767_s19 = smov 128  }
   0x6   :  { %s27_s18 = sshll.u32 %s766_s17, 4  ;;  %s768_s20 = smov 8   ;;  %s28_s18 = int_to_ptr.vmem [resolvable:$true] %s27_s18 }
   0x7   :  { %33 = dma.hbm_to_vmem [thread:$0]  %s26_s16, 32768, %s28_s18, [#allocation6], %s767_s19, %s767_s19, %s768_s20  }
   0x8   :  { %759 = dma.done.wait [#allocation3], 512  }
   0x9   :  { %760 = vsyncadd [#allocation3], 4294966784 }
   0xa   :  { %761 = dma.done.wait [#allocation6], 32768  }
   0xb   :  { %762 = vsyncadd [#allocation6], 4294934528  ;;  %v61_v0 = vld [vmem:[#allocation5 + $0x78] sm:$0xff]  ;;  %v60_v2 = vld [vmem:[#allocation5 + $0x70] sm:$0xff]  ;;  %s769_s0 = smov [#allocation7]   ;;  %s671_s23 = sshll.u32 %s817_s2, 4  ;;  %s672_s23 = int_to_ptr.hbm [resolvable:$true] %s671_s23 }
   0xc   :  { %v93_v1 = vld [vmem:[#allocation5 + $0x178] sm:$0xff]  ;;  %343 = vmatpush.msra.mxu0 %v61_v0  ;;  %v92_v4 = vld [vmem:[#allocation5 + $0x170] sm:$0xff]  ;;  %v59_v6 = vld [vmem:[#allocation5 + $0x68] sm:$0xff]  ;;  %s669_s1 = sshll.u32 %s769_s0, 4  ;;  %s670_s1 = int_to_ptr.vmem [resolvable:$true] %s669_s1 }
   0xd   :  { %383 = vmatpush.msra.mxu2 %v93_v1  ;;  %v77_v3 = vld [vmem:[#allocation5 + $0xf8] sm:$0xff]  ;;  %v76_v7 = vld [vmem:[#allocation5 + $0xf0] sm:$0xff]  ;;  %v91_v8 = vld [vmem:[#allocation5 + $0x168] sm:$0xff] }
   0xe   :  { %v109_v5 = vld [vmem:[#allocation5 + $0x1f8] sm:$0xff]  ;;  %363 = vmatpush.msra.mxu1 %v77_v3  ;;  %344 = vmatpush.msra.mxu0 %v60_v2  ;;  %v108_v9 = vld [vmem:[#allocation5 + $0x1f0] sm:$0xff]  ;;  %v75_v10 = vld [vmem:[#allocation5 + $0xe8] sm:$0xff] }
   0xf   :  { %403 = vmatpush.msra.mxu3 %v109_v5  ;;  %384 = vmatpush.msra.mxu2 %v92_v4  ;;  %v58_v11 = vld [vmem:[#allocation5 + $0x60] sm:$0xff]  ;;  %v107_v13 = vld [vmem:[#allocation5 + $0x1e8] sm:$0xff]  ;;  %v57_v16 = vld [vmem:[#allocation5 + $0x58] sm:$0xff] }
  0x10   :  { %364 = vmatpush.msra.mxu1 %v76_v7  ;;  %v90_v12 = vld [vmem:[#allocation5 + $0x160] sm:$0xff]  ;;  %345 = vmatpush.msra.mxu0 %v59_v6  ;;  %v89_v17 = vld [vmem:[#allocation5 + $0x158] sm:$0xff]  ;;  %v56_v20 = vld [vmem:[#allocation5 + $0x50] sm:$0xff] }
  0x11   :  { %404 = vmatpush.msra.mxu3 %v108_v9  ;;  %385 = vmatpush.msra.mxu2 %v91_v8  ;;  %v74_v14 = vld [vmem:[#allocation5 + $0xe0] sm:$0xff]  ;;  %v73_v18 = vld [vmem:[#allocation5 + $0xd8] sm:$0xff]  ;;  %v88_v21 = vld [vmem:[#allocation5 + $0x150] sm:$0xff] }
  0x12   :  { %v106_v15 = vld [vmem:[#allocation5 + $0x1e0] sm:$0xff]  ;;  %365 = vmatpush.msra.mxu1 %v75_v10  ;;  %346 = vmatpush.msra.mxu0 %v58_v11  ;;  %v105_v19 = vld [vmem:[#allocation5 + $0x1d8] sm:$0xff]  ;;  %v72_v22 = vld [vmem:[#allocation5 + $0xd0] sm:$0xff] }
  0x13   :  { %405 = vmatpush.msra.mxu3 %v107_v13  ;;  %386 = vmatpush.msra.mxu2 %v90_v12  ;;  %v104_v23 = vld [vmem:[#allocation5 + $0x1d0] sm:$0xff]  ;;  %v55_v24 = vld [vmem:[#allocation5 + $0x48] sm:$0xff]  ;;  %v54_v28 = vld [vmem:[#allocation5 + $0x40] sm:$0xff] }
  0x14   :  { %366 = vmatpush.msra.mxu1 %v74_v14  ;;  %347 = vmatpush.msra.mxu0 %v57_v16  ;;  %v87_v25 = vld [vmem:[#allocation5 + $0x148] sm:$0xff]  ;;  %v86_v29 = vld [vmem:[#allocation5 + $0x140] sm:$0xff]  ;;  %v53_v32 = vld [vmem:[#allocation5 + $0x38] sm:$0xff] }
  0x15   :  { %406 = vmatpush.msra.mxu3 %v106_v15  ;;  %387 = vmatpush.msra.mxu2 %v89_v17  ;;  %v71_v26 = vld [vmem:[#allocation5 + $0xc8] sm:$0xff]  ;;  %v70_v30 = vld [vmem:[#allocation5 + $0xc0] sm:$0xff]  ;;  %v85_v33 = vld [vmem:[#allocation5 + $0x138] sm:$0xff] }
  0x16   :  { %367 = vmatpush.msra.mxu1 %v73_v18  ;;  %348 = vmatpush.msra.mxu0 %v56_v20  ;;  %v103_v27 = vld [vmem:[#allocation5 + $0x1c8] sm:$0xff]  ;;  %v102_v31 = vld [vmem:[#allocation5 + $0x1c0] sm:$0xff]  ;;  %v69_v34 = vld [vmem:[#allocation5 + $0xb8] sm:$0xff] }
  0x17   :  { %407 = vmatpush.msra.mxu3 %v105_v19  ;;  %388 = vmatpush.msra.mxu2 %v88_v21  ;;  %v101_v35 = vld [vmem:[#allocation5 + $0x1b8] sm:$0xff]  ;;  %v52_v36 = vld [vmem:[#allocation5 + $0x30] sm:$0xff]  ;;  %v51_v40 = vld [vmem:[#allocation5 + $0x28] sm:$0xff] }
  0x18   :  { %368 = vmatpush.msra.mxu1 %v72_v22  ;;  %349 = vmatpush.msra.mxu0 %v55_v24  ;;  %v84_v37 = vld [vmem:[#allocation5 + $0x130] sm:$0xff]  ;;  %v83_v41 = vld [vmem:[#allocation5 + $0x128] sm:$0xff]  ;;  %v50_v44 = vld [vmem:[#allocation5 + $0x20] sm:$0xff] }
  0x19   :  { %408 = vmatpush.msra.mxu3 %v104_v23  ;;  %389 = vmatpush.msra.mxu2 %v87_v25  ;;  %v68_v38 = vld [vmem:[#allocation5 + $0xb0] sm:$0xff]  ;;  %v67_v42 = vld [vmem:[#allocation5 + $0xa8] sm:$0xff]  ;;  %v82_v45 = vld [vmem:[#allocation5 + $0x120] sm:$0xff] }
  0x1a   :  { %369 = vmatpush.msra.mxu1 %v71_v26  ;;  %350 = vmatpush.msra.mxu0 %v54_v28  ;;  %v100_v39 = vld [vmem:[#allocation5 + $0x1b0] sm:$0xff]  ;;  %v99_v43 = vld [vmem:[#allocation5 + $0x1a8] sm:$0xff]  ;;  %v66_v46 = vld [vmem:[#allocation5 + $0xa0] sm:$0xff] }
  0x1b   :  { %409 = vmatpush.msra.mxu3 %v103_v27  ;;  %390 = vmatpush.msra.mxu2 %v86_v29  ;;  %v98_v47 = vld [vmem:[#allocation5 + $0x1a0] sm:$0xff]  ;;  %v49_v48 = vld [vmem:[#allocation5 + $0x18] sm:$0xff]  ;;  %v48_v52 = vld [vmem:[#allocation5 + $0x10] sm:$0xff] }
  0x1c   :  { %370 = vmatpush.msra.mxu1 %v70_v30  ;;  %351 = vmatpush.msra.mxu0 %v53_v32  ;;  %v81_v49 = vld [vmem:[#allocation5 + $0x118] sm:$0xff]  ;;  %v80_v53 = vld [vmem:[#allocation5 + $0x110] sm:$0xff]  ;;  %v47_v56 = vld [vmem:[#allocation5 + $0x8] sm:$0xff] }
  0x1d   :  { %410 = vmatpush.msra.mxu3 %v102_v31  ;;  %391 = vmatpush.msra.mxu2 %v85_v33  ;;  %v65_v50 = vld [vmem:[#allocation5 + $0x98] sm:$0xff]  ;;  %v64_v54 = vld [vmem:[#allocation5 + $0x90] sm:$0xff]  ;;  %v79_v57 = vld [vmem:[#allocation5 + $0x108] sm:$0xff] }
  0x1e   :  { %371 = vmatpush.msra.mxu1 %v69_v34  ;;  %352 = vmatpush.msra.mxu0 %v52_v36  ;;  %v97_v51 = vld [vmem:[#allocation5 + $0x198] sm:$0xff]  ;;  %v96_v55 = vld [vmem:[#allocation5 + $0x190] sm:$0xff]  ;;  %v63_v58 = vld [vmem:[#allocation5 + $0x88] sm:$0xff] }
  0x1f   :  { %411 = vmatpush.msra.mxu3 %v101_v35  ;;  %392 = vmatpush.msra.mxu2 %v84_v37  ;;  %v95_v59 = vld [vmem:[#allocation5 + $0x188] sm:$0xff]  ;;  %v46_v60 = vld [vmem:[#allocation5] sm:$0xff]  ;;  %v125_v62 = vld [vmem:[#allocation5 + $0x278] sm:$0xff] }
  0x20   :  { %372 = vmatpush.msra.mxu1 %v68_v38  ;;  %353 = vmatpush.msra.mxu0 %v51_v40  ;;  %v78_v61 = vld [vmem:[#allocation5 + $0x100] sm:$0xff]  ;;  %v157_v63 = vld [vmem:[#allocation5 + $0x378] sm:$0xff]  ;;  %v124_v2 = vld [vmem:[#allocation5 + $0x270] sm:$0xff] }
  0x21   :  { %412 = vmatpush.msra.mxu3 %v100_v39  ;;  %393 = vmatpush.msra.mxu2 %v83_v41  ;;  %v62_v0 = vld [vmem:[#allocation5 + $0x80] sm:$0xff]  ;;  %v141_v3 = vld [vmem:[#allocation5 + $0x2f8] sm:$0xff]  ;;  %v156_v4 = vld [vmem:[#allocation5 + $0x370] sm:$0xff] }
  0x22   :  { %373 = vmatpush.msra.mxu1 %v67_v42  ;;  %354 = vmatpush.msra.mxu0 %v50_v44  ;;  %v94_v1 = vld [vmem:[#allocation5 + $0x180] sm:$0xff]  ;;  %v173_v5 = vld [vmem:[#allocation5 + $0x3f8] sm:$0xff]  ;;  %v123_v6 = vld [vmem:[#allocation5 + $0x268] sm:$0xff] }
  0x23   :  { %413 = vmatpush.msra.mxu3 %v99_v43  ;;  %394 = vmatpush.msra.mxu2 %v82_v45  ;;  %v140_v7 = vld [vmem:[#allocation5 + $0x2f0] sm:$0xff]  ;;  %v155_v8 = vld [vmem:[#allocation5 + $0x368] sm:$0xff]  ;;  %v122_v10 = vld [vmem:[#allocation5 + $0x260] sm:$0xff] }
  0x24   :  { %374 = vmatpush.msra.mxu1 %v66_v46  ;;  %355 = vmatpush.msra.mxu0 %v49_v48  ;;  %v172_v9 = vld [vmem:[#allocation5 + $0x3f0] sm:$0xff]  ;;  %v139_v11 = vld [vmem:[#allocation5 + $0x2e8] sm:$0xff]  ;;  %v154_v12 = vld [vmem:[#allocation5 + $0x360] sm:$0xff] }
  0x25   :  { %414 = vmatpush.msra.mxu3 %v98_v47  ;;  %395 = vmatpush.msra.mxu2 %v81_v49  ;;  %v171_v13 = vld [vmem:[#allocation5 + $0x3e8] sm:$0xff]  ;;  %v121_v14 = vld [vmem:[#allocation5 + $0x258] sm:$0xff]  ;;  %v138_v15 = vld [vmem:[#allocation5 + $0x2e0] sm:$0xff] }
  0x26   :  { %375 = vmatpush.msra.mxu1 %v65_v50  ;;  %356 = vmatpush.msra.mxu0 %v48_v52  ;;  %v153_v16 = vld [vmem:[#allocation5 + $0x358] sm:$0xff]  ;;  %v170_v17 = vld [vmem:[#allocation5 + $0x3e0] sm:$0xff]  ;;  %v120_v18 = vld [vmem:[#allocation5 + $0x250] sm:$0xff] }
  0x27   :  { %415 = vmatpush.msra.mxu3 %v97_v51  ;;  %396 = vmatpush.msra.mxu2 %v80_v53  ;;  %v137_v19 = vld [vmem:[#allocation5 + $0x2d8] sm:$0xff]  ;;  %v152_v20 = vld [vmem:[#allocation5 + $0x350] sm:$0xff]  ;;  %v42_v22 = vld [vmem:[#allocation2] sm:$0xff] }
  0x28   :  { %376 = vmatpush.msra.mxu1 %v64_v54  ;;  %357 = vmatpush.msra.mxu0 %v47_v56  ;;  %v169_v21 = vld [vmem:[#allocation5 + $0x3d8] sm:$0xff]  ;;  %v119_v23 = vld [vmem:[#allocation5 + $0x248] sm:$0xff]  ;;  %v136_v24 = vld [vmem:[#allocation5 + $0x2d0] sm:$0xff]  ;;  %306 = vst [vmem:[#allocation1] ss:$4 sm:$0xff] %v42_v22 }
  0x29   :  { %416 = vmatpush.msra.mxu3 %v96_v55  ;;  %397 = vmatpush.msra.mxu2 %v79_v57  ;;  %v151_v25 = vld [vmem:[#allocation5 + $0x348] sm:$0xff]  ;;  %v168_v26 = vld [vmem:[#allocation5 + $0x3d0] sm:$0xff]  ;;  %v118_v27 = vld [vmem:[#allocation5 + $0x240] sm:$0xff] }
  0x2a   :  { %377 = vmatpush.msra.mxu1 %v63_v58  ;;  %358 = vmatpush.msra.mxu0 %v46_v60  ;;  %v135_v28 = vld [vmem:[#allocation5 + $0x2c8] sm:$0xff]  ;;  %v150_v29 = vld [vmem:[#allocation5 + $0x340] sm:$0xff]  ;;  %v117_v31 = vld [vmem:[#allocation5 + $0x238] sm:$0xff] }
  0x2b   :  { %417 = vmatpush.msra.mxu3 %v95_v59  ;;  %398 = vmatpush.msra.mxu2 %v78_v61  ;;  %v167_v30 = vld [vmem:[#allocation5 + $0x3c8] sm:$0xff]  ;;  %v134_v32 = vld [vmem:[#allocation5 + $0x2c0] sm:$0xff]  ;;  %v149_v33 = vld [vmem:[#allocation5 + $0x338] sm:$0xff] }
  0x2c   :  { %423 = vmatpush.msrb.mxu0 %v125_v62  ;;  %378 = vmatpush.msra.mxu1 %v62_v0  ;;  %v166_v34 = vld [vmem:[#allocation5 + $0x3c0] sm:$0xff]  ;;  %v116_v35 = vld [vmem:[#allocation5 + $0x230] sm:$0xff]  ;;  %v133_v36 = vld [vmem:[#allocation5 + $0x2b8] sm:$0xff] }
  0x2d   :  { %463 = vmatpush.msrb.mxu2 %v157_v63  ;;  %418 = vmatpush.msra.mxu3 %v94_v1  ;;  %v148_v37 = vld [vmem:[#allocation5 + $0x330] sm:$0xff]  ;;  %v165_v38 = vld [vmem:[#allocation5 + $0x3b8] sm:$0xff]  ;;  %v43_v39 = vld [vmem:[#allocation2 + $0x8] sm:$0xff] }
  0x2e   :  { %424 = vmatpush.msrb.mxu0 %v124_v2  ;;  %443 = vmatpush.msrb.mxu1 %v141_v3  ;;  %v115_v40 = vld [vmem:[#allocation5 + $0x228] sm:$0xff]  ;;  %v132_v41 = vld [vmem:[#allocation5 + $0x2b0] sm:$0xff]  ;;  %308 = vst [vmem:[#allocation1 + $0x20] ss:$4 sm:$0xff] %v43_v39  ;;  %v114_v49 = vld [vmem:[#allocation5 + $0x220] sm:$0xff] }
  0x2f   :  { %464 = vmatpush.msrb.mxu2 %v156_v4  ;;  %483 = vmatpush.msrb.mxu3 %v173_v5  ;;  %v44_v42 = vld [vmem:[#allocation2 + $0x10] sm:$0xff]  ;;  %v147_v43 = vld [vmem:[#allocation5 + $0x328] sm:$0xff]  ;;  %v791_v45 = vld.sshfl [vmem:[#allocation1] sm:$0xff pattern:$0x73625140] }
  0x30   :  { %425 = vmatpush.msrb.mxu0 %v123_v6  ;;  %444 = vmatpush.msrb.mxu1 %v140_v7  ;;  %v311_v44 = vld.sshfl [vmem:[#allocation1 + $0x10] sm:$0xff pattern:$0x73625140]  ;;  %v793_v46 = vld.sshfl [vmem:[#allocation1 + $0x18] sm:$0xff pattern:$0x73625140] }
  0x31   :  { %465 = vmatpush.msrb.mxu2 %v155_v8  ;;  %484 = vmatpush.msrb.mxu3 %v172_v9  ;;  %v795_v47 = vld.sshfl [vmem:[#allocation1 + $0x8] sm:$0xff pattern:$0x73625140]  ;;  %v164_v48 = vld [vmem:[#allocation5 + $0x3b0] sm:$0xff]  ;;  %v131_v50 = vld [vmem:[#allocation5 + $0x2a8] sm:$0xff] }
  0x32   :  { %426 = vmatpush.msrb.mxu0 %v122_v10  ;;  %445 = vmatpush.msrb.mxu1 %v139_v11  ;;  %317 = vst [vmem:[#allocation1] ss:$4 sm:$0xff] %v44_v42  ;;  %v146_v51 = vld [vmem:[#allocation5 + $0x320] sm:$0xff]  ;;  %v163_v52 = vld [vmem:[#allocation5 + $0x3a8] sm:$0xff]  ;;  %v113_v53 = vld [vmem:[#allocation5 + $0x218] sm:$0xff] }
  0x33   :  { %466 = vmatpush.msrb.mxu2 %v154_v12  ;;  %485 = vmatpush.msrb.mxu3 %v171_v13  ;;  %v130_v54 = vld [vmem:[#allocation5 + $0x2a0] sm:$0xff]  ;;  %v145_v55 = vld [vmem:[#allocation5 + $0x318] sm:$0xff]  ;;  %v112_v57 = vld [vmem:[#allocation5 + $0x210] sm:$0xff] }
  0x34   :  { %427 = vmatpush.msrb.mxu0 %v121_v14  ;;  %446 = vmatpush.msrb.mxu1 %v138_v15  ;;  %v162_v56 = vld [vmem:[#allocation5 + $0x3a0] sm:$0xff]  ;;  %v129_v58 = vld [vmem:[#allocation5 + $0x298] sm:$0xff]  ;;  %v144_v0 = vld [vmem:[#allocation5 + $0x310] sm:$0xff] }
  0x35   :  { %467 = vmatpush.msrb.mxu2 %v153_v16  ;;  %486 = vmatpush.msrb.mxu3 %v170_v17  ;;  %v45_v59 = vld [vmem:[#allocation2 + $0x18] sm:$0xff]  ;;  %v797_v60 = vld.sshfl [vmem:[#allocation1 + $0x30] sm:$0xff pattern:$0x73625140]  ;;  %v128_v3 = vld [vmem:[#allocation5 + $0x290] sm:$0xff] }
  0x36   :  { %428 = vmatpush.msrb.mxu0 %v120_v18  ;;  %447 = vmatpush.msrb.mxu1 %v137_v19  ;;  %v799_v61 = vld.sshfl [vmem:[#allocation1 + $0x20] sm:$0xff pattern:$0x73625140]  ;;  %v801_v62 = vld.sshfl [vmem:[#allocation1 + $0x38] sm:$0xff pattern:$0x73625140] }
  0x37   :  { %468 = vmatpush.msrb.mxu2 %v152_v20  ;;  %487 = vmatpush.msrb.mxu3 %v169_v21  ;;  %v803_v63 = vld.sshfl [vmem:[#allocation1 + $0x28] sm:$0xff pattern:$0x73625140]  ;;  %v161_v1 = vld [vmem:[#allocation5 + $0x398] sm:$0xff]  ;;  %v111_v2 = vld [vmem:[#allocation5 + $0x208] sm:$0xff] }
  0x38   :  { %429 = vmatpush.msrb.mxu0 %v119_v23  ;;  %448 = vmatpush.msrb.mxu1 %v136_v24  ;;  %318 = vst [vmem:[#allocation1 + $0x20] ss:$4 sm:$0xff] %v45_v59  ;;  %v143_v4 = vld [vmem:[#allocation5 + $0x308] sm:$0xff]  ;;  %v160_v5 = vld [vmem:[#allocation5 + $0x390] sm:$0xff]  ;;  %v110_v6 = vld [vmem:[#allocation5 + $0x200] sm:$0xff] }
  0x39   :  { %469 = vmatpush.msrb.mxu2 %v151_v25  ;;  %488 = vmatpush.msrb.mxu3 %v168_v26  ;;  %v127_v7 = vld [vmem:[#allocation5 + $0x288] sm:$0xff]  ;;  %v142_v8 = vld [vmem:[#allocation5 + $0x300] sm:$0xff]  ;;  %v189_v10 = vld [vmem:[#allocation5 + $0x478] sm:$0xff] }
  0x3a   :  { %430 = vmatpush.msrb.mxu0 %v118_v27  ;;  %449 = vmatpush.msrb.mxu1 %v135_v28  ;;  %v159_v9 = vld [vmem:[#allocation5 + $0x388] sm:$0xff]  ;;  %v221_v11 = vld [vmem:[#allocation5 + $0x578] sm:$0xff]  ;;  %v126_v12 = vld [vmem:[#allocation5 + $0x280] sm:$0xff] }
  0x3b   :  { %470 = vmatpush.msrb.mxu2 %v150_v29  ;;  %489 = vmatpush.msrb.mxu3 %v167_v30  ;;  %v158_v13 = vld [vmem:[#allocation5 + $0x380] sm:$0xff]  ;;  %v188_v14 = vld [vmem:[#allocation5 + $0x470] sm:$0xff]  ;;  %v205_v15 = vld [vmem:[#allocation5 + $0x4f8] sm:$0xff] }
  0x3c   :  { %431 = vmatpush.msrb.mxu0 %v117_v31  ;;  %450 = vmatpush.msrb.mxu1 %v134_v32  ;;  %v220_v16 = vld [vmem:[#allocation5 + $0x570] sm:$0xff]  ;;  %v237_v17 = vld [vmem:[#allocation5 + $0x5f8] sm:$0xff]  ;;  %v187_v18 = vld [vmem:[#allocation5 + $0x468] sm:$0xff] }
  0x3d   :  { %471 = vmatpush.msrb.mxu2 %v149_v33  ;;  %490 = vmatpush.msrb.mxu3 %v166_v34  ;;  %v204_v19 = vld [vmem:[#allocation5 + $0x4f0] sm:$0xff]  ;;  %v219_v20 = vld [vmem:[#allocation5 + $0x568] sm:$0xff]  ;;  %v186_v22 = vld [vmem:[#allocation5 + $0x460] sm:$0xff] }
  0x3e   :  { %432 = vmatpush.msrb.mxu0 %v116_v35  ;;  %451 = vmatpush.msrb.mxu1 %v133_v36  ;;  %v236_v21 = vld [vmem:[#allocation5 + $0x5f0] sm:$0xff]  ;;  %v203_v23 = vld [vmem:[#allocation5 + $0x4e8] sm:$0xff]  ;;  %v218_v24 = vld [vmem:[#allocation5 + $0x560] sm:$0xff] }
  0x3f   :  { %472 = vmatpush.msrb.mxu2 %v148_v37  ;;  %491 = vmatpush.msrb.mxu3 %v165_v38  ;;  %v235_v25 = vld [vmem:[#allocation5 + $0x5e8] sm:$0xff]  ;;  %v185_v26 = vld [vmem:[#allocation5 + $0x458] sm:$0xff]  ;;  %v202_v27 = vld [vmem:[#allocation5 + $0x4e0] sm:$0xff] }
  0x40   :  { %433 = vmatpush.msrb.mxu0 %v115_v40  ;;  %452 = vmatpush.msrb.mxu1 %v132_v41  ;;  %v217_v28 = vld [vmem:[#allocation5 + $0x558] sm:$0xff]  ;;  %v234_v29 = vld [vmem:[#allocation5 + $0x5e0] sm:$0xff]  ;;  %v184_v30 = vld [vmem:[#allocation5 + $0x450] sm:$0xff] }
  0x41   :  { %473 = vmatpush.msrb.mxu2 %v147_v43  ;;  %492 = vmatpush.msrb.mxu3 %v164_v48  ;;  %v201_v31 = vld [vmem:[#allocation5 + $0x4d8] sm:$0xff]  ;;  %v216_v32 = vld [vmem:[#allocation5 + $0x550] sm:$0xff]  ;;  %v183_v34 = vld [vmem:[#allocation5 + $0x448] sm:$0xff] }
  0x42   :  { %434 = vmatpush.msrb.mxu0 %v114_v49  ;;  %453 = vmatpush.msrb.mxu1 %v131_v50  ;;  %v233_v33 = vld [vmem:[#allocation5 + $0x5d8] sm:$0xff]  ;;  %v200_v35 = vld [vmem:[#allocation5 + $0x4d0] sm:$0xff]  ;;  %v215_v36 = vld [vmem:[#allocation5 + $0x548] sm:$0xff] }
  0x43   :  { %474 = vmatpush.msrb.mxu2 %v146_v51  ;;  %493 = vmatpush.msrb.mxu3 %v163_v52  ;;  %v232_v37 = vld [vmem:[#allocation5 + $0x5d0] sm:$0xff]  ;;  %v182_v38 = vld [vmem:[#allocation5 + $0x440] sm:$0xff]  ;;  %v199_v39 = vld [vmem:[#allocation5 + $0x4c8] sm:$0xff] }
  0x44   :  { %435 = vmatpush.msrb.mxu0 %v113_v53  ;;  %454 = vmatpush.msrb.mxu1 %v130_v54  ;;  %v214_v40 = vld [vmem:[#allocation5 + $0x540] sm:$0xff]  ;;  %v231_v41 = vld [vmem:[#allocation5 + $0x5c8] sm:$0xff]  ;;  %v181_v42 = vld [vmem:[#allocation5 + $0x438] sm:$0xff] }
  0x45   :  { %475 = vmatpush.msrb.mxu2 %v145_v55  ;;  %494 = vmatpush.msrb.mxu3 %v162_v56  ;;  %v198_v43 = vld [vmem:[#allocation5 + $0x4c0] sm:$0xff]  ;;  %v212_v48 = vld [vmem:[#allocation5 + $0x530] sm:$0xff]  ;;  %v229_v49 = vld [vmem:[#allocation5 + $0x5b8] sm:$0xff] }
  0x46   :  { %436 = vmatpush.msrb.mxu0 %v112_v57  ;;  %455 = vmatpush.msrb.mxu1 %v129_v58  ;;  %v179_v50 = vld [vmem:[#allocation5 + $0x428] sm:$0xff]  ;;  %v196_v51 = vld [vmem:[#allocation5 + $0x4b0] sm:$0xff]  ;;  %v178_v54 = vld [vmem:[#allocation5 + $0x420] sm:$0xff] }
  0x47   :  { %476 = vmatpush.msrb.mxu2 %v144_v0  ;;  %495 = vmatpush.msrb.mxu3 %v161_v1  ;;  %v211_v52 = vld [vmem:[#allocation5 + $0x528] sm:$0xff]  ;;  %v228_v53 = vld [vmem:[#allocation5 + $0x5b0] sm:$0xff]  ;;  %v210_v56 = vld [vmem:[#allocation5 + $0x520] sm:$0xff] }
  0x48   :  { %437 = vmatpush.msrb.mxu0 %v111_v2  ;;  %456 = vmatpush.msrb.mxu1 %v128_v3  ;;  %v195_v55 = vld [vmem:[#allocation5 + $0x4a8] sm:$0xff]  ;;  %v177_v58 = vld [vmem:[#allocation5 + $0x418] sm:$0xff]  ;;  %v194_v59 = vld [vmem:[#allocation5 + $0x4a0] sm:$0xff] }
  0x49   :  { %477 = vmatpush.msrb.mxu2 %v143_v4  ;;  %496 = vmatpush.msrb.mxu3 %v160_v5  ;;  %v227_v57 = vld [vmem:[#allocation5 + $0x5a8] sm:$0xff]  ;;  %v208_v0 = vld [vmem:[#allocation5 + $0x510] sm:$0xff]  ;;  %v225_v1 = vld [vmem:[#allocation5 + $0x598] sm:$0xff] }
  0x4a   :  { %399 = vmatmul.f32.vlgmr.msra.gmra.mxu2 %v311_v44  ;;  %438 = vmatpush.msrb.mxu0 %v110_v6  ;;  %v213_v44 = vld [vmem:[#allocation5 + $0x538] sm:$0xff]  ;;  %v175_v2 = vld [vmem:[#allocation5 + $0x408] sm:$0xff]  ;;  %v192_v3 = vld [vmem:[#allocation5 + $0x490] sm:$0xff] }
  0x4b   :  { %457 = vmatpush.msrb.mxu1 %v127_v7  ;;  %478 = vmatpush.msrb.mxu2 %v142_v8  ;;  %v207_v4 = vld [vmem:[#allocation5 + $0x508] sm:$0xff]  ;;  %v224_v5 = vld [vmem:[#allocation5 + $0x590] sm:$0xff]  ;;  %v174_v6 = vld [vmem:[#allocation5 + $0x400] sm:$0xff] }
  0x4c   :  { %497 = vmatpush.msrb.mxu3 %v159_v9  ;;  %359 = vmatmul.f32.vlgmr.msra.gmra.mxu0 %v791_v45  ;;  %v230_v45 = vld [vmem:[#allocation5 + $0x5c0] sm:$0xff]  ;;  %v191_v7 = vld [vmem:[#allocation5 + $0x488] sm:$0xff] }
  0x4d   :  { %419 = vmatmul.f32.vlgmr.msra.gmra.mxu3 %v793_v46  ;;  %503 = vmatpush.msra.mxu0 %v189_v10  ;;  %v180_v46 = vld [vmem:[#allocation5 + $0x430] sm:$0xff]  ;;  %v206_v8 = vld [vmem:[#allocation5 + $0x500] sm:$0xff]  ;;  %v223_v9 = vld [vmem:[#allocation5 + $0x588] sm:$0xff] }
  0x4e   :  { %543 = vmatpush.msra.mxu2 %v221_v11  ;;  %458 = vmatpush.msrb.mxu1 %v126_v12  ;;  %v319_v10 = vld.sshfl [vmem:[#allocation1] sm:$0xff pattern:$0x73625140]  ;;  %v321_v11 = vld.sshfl [vmem:[#allocation1 + $0x10] sm:$0xff pattern:$0x73625140] }
  0x4f   :  { %498 = vmatpush.msrb.mxu3 %v158_v13  ;;  %379 = vmatmul.f32.vlgmr.msra.gmra.mxu1 %v795_v47  ;;  %v197_v47 = vld [vmem:[#allocation5 + $0x4b8] sm:$0xff] }
  0x50   :  { %504 = vmatpush.msra.mxu0 %v188_v14  ;;  %523 = vmatpush.msra.mxu1 %v205_v15  ;;  %v253_v12 = vld [vmem:[#allocation5 + $0x678] sm:$0xff]  ;;  %v190_v14 = vld [vmem:[#allocation5 + $0x480] sm:$0xff] }
  0x51   :  { %544 = vmatpush.msra.mxu2 %v220_v16  ;;  %563 = vmatpush.msra.mxu3 %v237_v17  ;;  %v285_v13 = vld [vmem:[#allocation5 + $0x778] sm:$0xff]  ;;  %v222_v15 = vld [vmem:[#allocation5 + $0x580] sm:$0xff]  ;;  %v322_v17 = vld.sshfl [vmem:[#allocation1 + $0x18] sm:$0xff pattern:$0x73625140] }
  0x52   :  { %505 = vmatpush.msra.mxu0 %v187_v18  ;;  %524 = vmatpush.msra.mxu1 %v204_v19  ;;  %v320_v16 = vld.sshfl [vmem:[#allocation1 + $0x8] sm:$0xff pattern:$0x73625140]  ;;  %v252_v18 = vld [vmem:[#allocation5 + $0x670] sm:$0xff]  ;;  %v269_v19 = vld [vmem:[#allocation5 + $0x6f8] sm:$0xff] }
  0x53   :  { %545 = vmatpush.msra.mxu2 %v219_v20  ;;  %564 = vmatpush.msra.mxu3 %v236_v21  ;;  %v284_v20 = vld [vmem:[#allocation5 + $0x770] sm:$0xff]  ;;  %v301_v21 = vld [vmem:[#allocation5 + $0x7f8] sm:$0xff] }
  0x54   :  { %479 = vmatmul.f32.vlgmr.msrb.gmra.mxu2 %v797_v60  ;;  %506 = vmatpush.msra.mxu0 %v186_v22  ;;  %v209_v60 = vld [vmem:[#allocation5 + $0x518] sm:$0xff]  ;;  %v251_v22 = vld [vmem:[#allocation5 + $0x668] sm:$0xff] }
  0x55   :  { %525 = vmatpush.msra.mxu1 %v203_v23  ;;  %546 = vmatpush.msra.mxu2 %v218_v24  ;;  %v268_v23 = vld [vmem:[#allocation5 + $0x6f0] sm:$0xff]  ;;  %v283_v24 = vld [vmem:[#allocation5 + $0x768] sm:$0xff] }
  0x56   :  { %565 = vmatpush.msra.mxu3 %v235_v25  ;;  %439 = vmatmul.f32.vlgmr.msrb.gmra.mxu0 %v799_v61  ;;  %v226_v61 = vld [vmem:[#allocation5 + $0x5a0] sm:$0xff]  ;;  %v300_v25 = vld [vmem:[#allocation5 + $0x7f0] sm:$0xff] }
  0x57   :  { %499 = vmatmul.f32.vlgmr.msrb.gmra.mxu3 %v801_v62  ;;  %507 = vmatpush.msra.mxu0 %v185_v26  ;;  %v176_v62 = vld [vmem:[#allocation5 + $0x410] sm:$0xff]  ;;  %v250_v26 = vld [vmem:[#allocation5 + $0x660] sm:$0xff] }
  0x58   :  { %526 = vmatpush.msra.mxu1 %v202_v27  ;;  %547 = vmatpush.msra.mxu2 %v217_v28  ;;  %v267_v27 = vld [vmem:[#allocation5 + $0x6e8] sm:$0xff]  ;;  %v282_v28 = vld [vmem:[#allocation5 + $0x760] sm:$0xff] }
  0x59   :  { %566 = vmatpush.msra.mxu3 %v234_v29  ;;  %459 = vmatmul.f32.vlgmr.msrb.gmra.mxu1 %v803_v63  ;;  %v193_v63 = vld [vmem:[#allocation5 + $0x498] sm:$0xff]  ;;  %v299_v29 = vld [vmem:[#allocation5 + $0x7e8] sm:$0xff] }
  0x5a   :  { %508 = vmatpush.msra.mxu0 %v184_v30  ;;  %527 = vmatpush.msra.mxu1 %v201_v31  ;;  %v249_v30 = vld [vmem:[#allocation5 + $0x658] sm:$0xff]  ;;  %v266_v31 = vld [vmem:[#allocation5 + $0x6e0] sm:$0xff] }
  0x5b   :  { %548 = vmatpush.msra.mxu2 %v216_v32  ;;  %567 = vmatpush.msra.mxu3 %v233_v33  ;;  %v281_v32 = vld [vmem:[#allocation5 + $0x758] sm:$0xff]  ;;  %v298_v33 = vld [vmem:[#allocation5 + $0x7e0] sm:$0xff] }
  0x5c   :  { %509 = vmatpush.msra.mxu0 %v183_v34  ;;  %528 = vmatpush.msra.mxu1 %v200_v35  ;;  %v248_v34 = vld [vmem:[#allocation5 + $0x650] sm:$0xff]  ;;  %v265_v35 = vld [vmem:[#allocation5 + $0x6d8] sm:$0xff] }
  0x5d   :  { %549 = vmatpush.msra.mxu2 %v215_v36  ;;  %568 = vmatpush.msra.mxu3 %v232_v37  ;;  %v280_v36 = vld [vmem:[#allocation5 + $0x750] sm:$0xff]  ;;  %v297_v37 = vld [vmem:[#allocation5 + $0x7d8] sm:$0xff] }
  0x5e   :  { %510 = vmatpush.msra.mxu0 %v182_v38  ;;  %529 = vmatpush.msra.mxu1 %v199_v39  ;;  %v247_v38 = vld [vmem:[#allocation5 + $0x648] sm:$0xff]  ;;  %v264_v39 = vld [vmem:[#allocation5 + $0x6d0] sm:$0xff] }
  0x5f   :  { %550 = vmatpush.msra.mxu2 %v214_v40  ;;  %569 = vmatpush.msra.mxu3 %v231_v41  ;;  %v279_v40 = vld [vmem:[#allocation5 + $0x748] sm:$0xff]  ;;  %v296_v41 = vld [vmem:[#allocation5 + $0x7d0] sm:$0xff] }
  0x60   :  { %511 = vmatpush.msra.mxu0 %v181_v42  ;;  %530 = vmatpush.msra.mxu1 %v198_v43  ;;  %v246_v42 = vld [vmem:[#allocation5 + $0x640] sm:$0xff]  ;;  %v263_v43 = vld [vmem:[#allocation5 + $0x6c8] sm:$0xff] }
  0x61   :  { %551 = vmatpush.msra.mxu2 %v213_v44  ;;  %570 = vmatpush.msra.mxu3 %v230_v45  ;;  %v278_v44 = vld [vmem:[#allocation5 + $0x740] sm:$0xff]  ;;  %v295_v45 = vld [vmem:[#allocation5 + $0x7c8] sm:$0xff] }
  0x62   :  { %512 = vmatpush.msra.mxu0 %v180_v46  ;;  %531 = vmatpush.msra.mxu1 %v197_v47  ;;  %v245_v46 = vld [vmem:[#allocation5 + $0x638] sm:$0xff]  ;;  %v262_v47 = vld [vmem:[#allocation5 + $0x6c0] sm:$0xff] }
  0x63   :  { %552 = vmatpush.msra.mxu2 %v212_v48  ;;  %571 = vmatpush.msra.mxu3 %v229_v49  ;;  %v277_v48 = vld [vmem:[#allocation5 + $0x738] sm:$0xff]  ;;  %v294_v49 = vld [vmem:[#allocation5 + $0x7c0] sm:$0xff] }
  0x64   :  { %513 = vmatpush.msra.mxu0 %v179_v50  ;;  %532 = vmatpush.msra.mxu1 %v196_v51  ;;  %v244_v50 = vld [vmem:[#allocation5 + $0x630] sm:$0xff]  ;;  %v261_v51 = vld [vmem:[#allocation5 + $0x6b8] sm:$0xff] }
  0x65   :  { %553 = vmatpush.msra.mxu2 %v211_v52  ;;  %572 = vmatpush.msra.mxu3 %v228_v53  ;;  %v276_v52 = vld [vmem:[#allocation5 + $0x730] sm:$0xff]  ;;  %v293_v53 = vld [vmem:[#allocation5 + $0x7b8] sm:$0xff] }
  0x66   :  { %514 = vmatpush.msra.mxu0 %v178_v54  ;;  %533 = vmatpush.msra.mxu1 %v195_v55  ;;  %v243_v54 = vld [vmem:[#allocation5 + $0x628] sm:$0xff]  ;;  %v260_v55 = vld [vmem:[#allocation5 + $0x6b0] sm:$0xff] }
  0x67   :  { %554 = vmatpush.msra.mxu2 %v210_v56  ;;  %573 = vmatpush.msra.mxu3 %v227_v57  ;;  %v275_v56 = vld [vmem:[#allocation5 + $0x728] sm:$0xff]  ;;  %v292_v57 = vld [vmem:[#allocation5 + $0x7b0] sm:$0xff] }
  0x68   :  { %515 = vmatpush.msra.mxu0 %v177_v58  ;;  %534 = vmatpush.msra.mxu1 %v194_v59  ;;  %v242_v58 = vld [vmem:[#allocation5 + $0x620] sm:$0xff]  ;;  %v259_v59 = vld [vmem:[#allocation5 + $0x6a8] sm:$0xff] }
  0x69   :  { %555 = vmatpush.msra.mxu2 %v209_v60  ;;  %574 = vmatpush.msra.mxu3 %v226_v61  ;;  %v274_v60 = vld [vmem:[#allocation5 + $0x720] sm:$0xff]  ;;  %v291_v61 = vld [vmem:[#allocation5 + $0x7a8] sm:$0xff] }
  0x6a   :  { %516 = vmatpush.msra.mxu0 %v176_v62  ;;  %535 = vmatpush.msra.mxu1 %v193_v63  ;;  %v241_v62 = vld [vmem:[#allocation5 + $0x618] sm:$0xff]  ;;  %v258_v63 = vld [vmem:[#allocation5 + $0x6a0] sm:$0xff] }
  0x6b   :  { %556 = vmatpush.msra.mxu2 %v208_v0  ;;  %575 = vmatpush.msra.mxu3 %v225_v1  ;;  %v273_v0 = vld [vmem:[#allocation5 + $0x718] sm:$0xff]  ;;  %v290_v1 = vld [vmem:[#allocation5 + $0x7a0] sm:$0xff] }
  0x6c   :  { %517 = vmatpush.msra.mxu0 %v175_v2  ;;  %536 = vmatpush.msra.mxu1 %v192_v3  ;;  %v240_v2 = vld [vmem:[#allocation5 + $0x610] sm:$0xff]  ;;  %v257_v3 = vld [vmem:[#allocation5 + $0x698] sm:$0xff] }
  0x6d   :  { %557 = vmatpush.msra.mxu2 %v207_v4  ;;  %576 = vmatpush.msra.mxu3 %v224_v5  ;;  %v272_v4 = vld [vmem:[#allocation5 + $0x710] sm:$0xff]  ;;  %v289_v5 = vld [vmem:[#allocation5 + $0x798] sm:$0xff] }
  0x6e   :  { %518 = vmatpush.msra.mxu0 %v174_v6  ;;  %537 = vmatpush.msra.mxu1 %v191_v7  ;;  %v239_v6 = vld [vmem:[#allocation5 + $0x608] sm:$0xff]  ;;  %v256_v7 = vld [vmem:[#allocation5 + $0x690] sm:$0xff] }
  0x6f   :  { %558 = vmatpush.msra.mxu2 %v206_v8  ;;  %577 = vmatpush.msra.mxu3 %v223_v9  ;;  %v271_v8 = vld [vmem:[#allocation5 + $0x708] sm:$0xff]  ;;  %v288_v9 = vld [vmem:[#allocation5 + $0x790] sm:$0xff] }
  0x70   :  { %519 = vmatmul.f32.vlgmr.msra.gmra.mxu0 %v319_v10  ;;  %559 = vmatmul.f32.vlgmr.msra.gmra.mxu2 %v321_v11  ;;  %v238_v10 = vld [vmem:[#allocation5 + $0x600] sm:$0xff]  ;;  %v255_v11 = vld [vmem:[#allocation5 + $0x688] sm:$0xff] }
  0x71   :  { %583 = vmatpush.msrb.mxu0 %v253_v12  ;;  %623 = vmatpush.msrb.mxu2 %v285_v13  ;;  %v270_v12 = vld [vmem:[#allocation5 + $0x700] sm:$0xff]  ;;  %v287_v13 = vld [vmem:[#allocation5 + $0x788] sm:$0xff] }
  0x72   :  { %538 = vmatpush.msra.mxu1 %v190_v14  ;;  %578 = vmatpush.msra.mxu3 %v222_v15  ;;  %v323_v14 = vld.sshfl [vmem:[#allocation1 + $0x20] sm:$0xff pattern:$0x73625140]  ;;  %v325_v15 = vld.sshfl [vmem:[#allocation1 + $0x30] sm:$0xff pattern:$0x73625140] }
  0x73   :  { %539 = vmatmul.f32.vlgmr.msra.gmra.mxu1 %v320_v16  ;;  %579 = vmatmul.f32.vlgmr.msra.gmra.mxu3 %v322_v17  ;;  %v254_v16 = vld [vmem:[#allocation5 + $0x680] sm:$0xff] }
  0x74   :  { %584 = vmatpush.msrb.mxu0 %v252_v18  ;;  %603 = vmatpush.msrb.mxu1 %v269_v19  ;;  %v286_v17 = vld [vmem:[#allocation5 + $0x780] sm:$0xff]  ;;  %v326_v19 = vld.sshfl [vmem:[#allocation1 + $0x38] sm:$0xff pattern:$0x73625140] }
  0x75   :  { %624 = vmatpush.msrb.mxu2 %v284_v20  ;;  %643 = vmatpush.msrb.mxu3 %v301_v21  ;;  %v324_v18 = vld.sshfl [vmem:[#allocation1 + $0x28] sm:$0xff pattern:$0x73625140] }
  0x76   :  { %585 = vmatpush.msrb.mxu0 %v251_v22  ;;  %604 = vmatpush.msrb.mxu1 %v268_v23 }
  0x77   :  { %625 = vmatpush.msrb.mxu2 %v283_v24  ;;  %644 = vmatpush.msrb.mxu3 %v300_v25 }
  0x78   :  { %586 = vmatpush.msrb.mxu0 %v250_v26  ;;  %605 = vmatpush.msrb.mxu1 %v267_v27 }
  0x79   :  { %626 = vmatpush.msrb.mxu2 %v282_v28  ;;  %645 = vmatpush.msrb.mxu3 %v299_v29 }
  0x7a   :  { %587 = vmatpush.msrb.mxu0 %v249_v30  ;;  %606 = vmatpush.msrb.mxu1 %v266_v31 }
  0x7b   :  { %627 = vmatpush.msrb.mxu2 %v281_v32  ;;  %646 = vmatpush.msrb.mxu3 %v298_v33 }
  0x7c   :  { %588 = vmatpush.msrb.mxu0 %v248_v34  ;;  %607 = vmatpush.msrb.mxu1 %v265_v35 }
  0x7d   :  { %628 = vmatpush.msrb.mxu2 %v280_v36  ;;  %647 = vmatpush.msrb.mxu3 %v297_v37 }
  0x7e   :  { %589 = vmatpush.msrb.mxu0 %v247_v38  ;;  %608 = vmatpush.msrb.mxu1 %v264_v39 }
  0x7f   :  { %629 = vmatpush.msrb.mxu2 %v279_v40  ;;  %648 = vmatpush.msrb.mxu3 %v296_v41 }
  0x80   :  { %590 = vmatpush.msrb.mxu0 %v246_v42  ;;  %609 = vmatpush.msrb.mxu1 %v263_v43 }
  0x81   :  { %630 = vmatpush.msrb.mxu2 %v278_v44  ;;  %649 = vmatpush.msrb.mxu3 %v295_v45 }
  0x82   :  { %591 = vmatpush.msrb.mxu0 %v245_v46  ;;  %610 = vmatpush.msrb.mxu1 %v262_v47 }
  0x83   :  { %631 = vmatpush.msrb.mxu2 %v277_v48  ;;  %650 = vmatpush.msrb.mxu3 %v294_v49 }
  0x84   :  { %592 = vmatpush.msrb.mxu0 %v244_v50  ;;  %611 = vmatpush.msrb.mxu1 %v261_v51 }
  0x85   :  { %632 = vmatpush.msrb.mxu2 %v276_v52  ;;  %651 = vmatpush.msrb.mxu3 %v293_v53 }
  0x86   :  { %593 = vmatpush.msrb.mxu0 %v243_v54  ;;  %612 = vmatpush.msrb.mxu1 %v260_v55 }
  0x87   :  { %633 = vmatpush.msrb.mxu2 %v275_v56  ;;  %652 = vmatpush.msrb.mxu3 %v292_v57 }
  0x88   :  { %594 = vmatpush.msrb.mxu0 %v242_v58  ;;  %613 = vmatpush.msrb.mxu1 %v259_v59 }
  0x89   :  { %634 = vmatpush.msrb.mxu2 %v274_v60  ;;  %653 = vmatpush.msrb.mxu3 %v291_v61 }
  0x8a   :  { %595 = vmatpush.msrb.mxu0 %v241_v62  ;;  %614 = vmatpush.msrb.mxu1 %v258_v63 }
  0x8b   :  { %635 = vmatpush.msrb.mxu2 %v273_v0  ;;  %654 = vmatpush.msrb.mxu3 %v290_v1 }
  0x8c   :  { %596 = vmatpush.msrb.mxu0 %v240_v2  ;;  %615 = vmatpush.msrb.mxu1 %v257_v3 }
  0x8d   :  { %636 = vmatpush.msrb.mxu2 %v272_v4  ;;  %655 = vmatpush.msrb.mxu3 %v289_v5 }
  0x8e   :  { %597 = vmatpush.msrb.mxu0 %v239_v6  ;;  %616 = vmatpush.msrb.mxu1 %v256_v7 }
  0x8f   :  { %637 = vmatpush.msrb.mxu2 %v271_v8  ;;  %656 = vmatpush.msrb.mxu3 %v288_v9 }
  0x90   :  { %598 = vmatpush.msrb.mxu0 %v238_v10  ;;  %617 = vmatpush.msrb.mxu1 %v255_v11 }
  0x91   :  { %638 = vmatpush.msrb.mxu2 %v270_v12  ;;  %657 = vmatpush.msrb.mxu3 %v287_v13 }
  0x92   :  { %599 = vmatmul.f32.vlgmr.msrb.gmra.mxu0 %v323_v14  ;;  %639 = vmatmul.f32.vlgmr.msrb.gmra.mxu2 %v325_v15 }
  0x93   :  { %618 = vmatpush.msrb.mxu1 %v254_v16  ;;  %658 = vmatpush.msrb.mxu3 %v286_v17 }
  0x94   :  { %619 = vmatmul.f32.vlgmr.msrb.gmra.mxu1 %v324_v18  ;;  %659 = vmatmul.f32.vlgmr.msrb.gmra.mxu3 %v326_v19 }
  0xc9   :  { %v360_v21 = vpop.f32.mrf.mxu0 }
  0xcc   :  { %v380_v20 = vpop.f32.mrf.mxu1 }
  0xcd   :  { %v381_v22 = vadd.f32 %v380_v20, %v360_v21  ;;  %v400_v23 = vpop.f32.mrf.mxu2 }
  0xcf   :  { %v401_v24 = vadd.f32 %v400_v23, %v381_v22 }
  0xd0   :  { %v420_v25 = vpop.f32.mrf.mxu3 }
  0xd1   :  { %v421_v26 = vadd.f32 %v420_v25, %v401_v24 }
  0xd3   :  { %v440_v27 = vpop.f32.mrf.mxu0 }
  0xd4   :  { %v441_v28 = vadd.f32 %v440_v27, %v421_v26 }
  0xd6   :  { %v460_v29 = vpop.f32.mrf.mxu1 }
  0xd7   :  { %v461_v30 = vadd.f32 %v460_v29, %v441_v28  ;;  %v480_v31 = vpop.f32.mrf.mxu2 }
  0xd9   :  { %v481_v32 = vadd.f32 %v480_v31, %v461_v30 }
  0xda   :  { %v500_v33 = vpop.f32.mrf.mxu3 }
  0xdb   :  { %v501_v35 = vadd.f32 %v500_v33, %v481_v32 }
  0xed   :  { %v520_v34 = vpop.f32.mrf.mxu0 }
  0xee   :  { %v521_v36 = vadd.f32 %v520_v34, %v501_v35 }
  0xf0   :  { %v540_v37 = vpop.f32.mrf.mxu1 }
  0xf1   :  { %v541_v39 = vadd.f32 %v540_v37, %v521_v36 }
  0xf3   :  { %v560_v38 = vpop.f32.mrf.mxu2 }
  0xf4   :  { %v561_v40 = vadd.f32 %v560_v38, %v541_v39 }
  0xf6   :  { %v580_v41 = vpop.f32.mrf.mxu3 }
  0xf7   :  { %v581_v42 = vadd.f32 %v580_v41, %v561_v40 }
 0x10f   :  { %v600_v43 = vpop.f32.mrf.mxu0 }
 0x110   :  { %v601_v44 = vadd.f32 %v600_v43, %v581_v42 }
 0x111   :  { %v620_v45 = vpop.f32.mrf.mxu1 }
 0x112   :  { %v621_v46 = vadd.f32 %v620_v45, %v601_v44 }
 0x115   :  { %v640_v47 = vpop.f32.mrf.mxu2 }
 0x116   :  { %v641_v48 = vadd.f32 %v640_v47, %v621_v46 }
 0x117   :  { %v660_v49 = vpop.f32.mrf.mxu3 }
 0x118   :  { %v661_v50 = vadd.f32 %v660_v49, %v641_v48 }
 0x11a   :  { %663 = vst [vmem:[#allocation7] sm:$0x3] %v661_v50 }
 0x11b   :  { %674 = dma.vmem_to_hbm [thread:$0]  %s670_s1, 32, %s672_s23, [#allocation4]  }
 0x11c   :  { %763 = dma.done.wait [#allocation4], 32  }
 0x11d   :  { %764 = vsyncadd [#allocation4], 4294967264 }
 0x11e   :  { %679 = vsyncpa [#allocation3], 1 }
 0x11f   :  { %680 = vsyncpa [#allocation6], 1 }
 0x120   :  { %681 = vsyncpa [#allocation4], 1 }

</bundles_post_ra>
